<compile_context>
chip_gen: v7x
topology: tpu7x:2x2x1
jax: 0.10.0
libtpu: 0.0.40
codegen_flags: <defaults>
</compile_context>

<pallas_src>
import functools

import jax
import jax.numpy as jnp
from jax import lax
from jax.experimental import pallas as pl
from jax.experimental.pallas import tpu as pltpu


def _inception_kernel(x_ref, wa_ref, ba_ref, wb_ref, bb_ref, o_ref,
                      *, L, C1, C3r, C5r):
    # x_ref: (R, Cin) channel-last rows, R = NB * L (row r = sample n, pos t).
    x = x_ref[...]
    R = x.shape[0]
    relu = lambda a: jnp.maximum(a, 0.0)

    # ---- stage 1: fused 1x1 convs (conv1 | dimred3 | dimred5) -> one matmul.
    h = relu(jnp.dot(x, wa_ref[...], preferred_element_type=jnp.float32)
             + ba_ref[...])
    one_d = h[:, :C1]                     # branch-1 output (already ReLU'd)
    red3 = h[:, C1:C1 + C3r]              # reduced input of conv3
    red5 = h[:, C1 + C3r:C1 + C3r + C5r]  # reduced input of conv5

    # Position within each sample, for edge / sample-boundary masking.
    t = lax.broadcasted_iota(jnp.int32, (R, 1), 0) % L

    def shifted(v, s, fill):
        # v[r] -> v[r + s] within the same sample; `fill` outside [0, L).
        if s == 0:
            return v
        rolled = pltpu.roll(v, shift=(-s) % R, axis=0)   # XLU sublane rotate
        ts = t + s
        return jnp.where((ts >= 0) & (ts < L), rolled, fill)

    # ---- stage 2 rows: [one_d | im2col(red3, K=3) | im2col(red5, K=5) | pool]
    pieces = [one_d]
    pieces += [shifted(red3, k - 1, 0.0) for k in range(3)]   # zero padding 1
    pieces += [shifted(red5, k - 2, 0.0) for k in range(5)]   # zero padding 2
    pooled = x                                                # maxpool(3,1,1)
    for s in (-1, 1):
        pooled = jnp.maximum(pooled, shifted(x, s, -jnp.inf))
    pieces.append(relu(pooled))
    rows = jnp.concatenate(pieces, axis=-1)                   # (R, Kb)

    # ---- stage 2: one block-diagonal matmul -> all output channels,
    # lane-dense (padded to 128) single full-tile store.
    out = relu(jnp.dot(rows, wb_ref[...], preferred_element_type=jnp.float32)
               + bb_ref[...])
    o_ref[...] = out.astype(o_ref.dtype)


def inception_block_pallas(x_ncl, params):
    """x_ncl: (N, Cin, L) float32 (PyTorch NCL). Returns (N, Ctot, L)."""
    (w1, b1, w3r, b3r, w3, b3, w5r, b5r, w5, b5, wm, bm) = params
    N, Cin, L = x_ncl.shape
    C1, C3, C5, Cm = w1.shape[0], w3.shape[0], w5.shape[0], wm.shape[0]
    C3r, C5r = w3r.shape[0], w5r.shape[0]
    Ctot = C1 + C3 + C5 + Cm
    Cpad = 128 * pl.cdiv(Ctot, 128)        # lane-dense output width

    # Batch elements per grid step: whole batch unless a smaller divisor of N
    # already gives >=128 rows (keeps rows a multiple of 8 when splitting).
    NB = N
    for d in range(1, N + 1):
        if N % d == 0 and (d * L) % 8 == 0 and d * L >= 128:
            NB = d
            break
    R = NB * L

    f32 = jnp.float32
    w1x1 = lambda w: jnp.transpose(w[:, :, 0], (1, 0))        # (Ci, Co)

    # Fused stage-1 weight/bias: [conv1 | dimred3 | dimred5].
    Wa = jnp.concatenate([w1x1(w1), w1x1(w3r), w1x1(w5r)], axis=1)  # (Cin, Ca)
    ba = jnp.concatenate([b1, b3r, b5r]).reshape(1, -1)

    # Fused stage-2 block-diagonal weight/bias, zero-padded to Cpad lanes:
    #   rows:  [I(C1) pass-through | conv3 taps | conv5 taps | dimredmax]
    #   cols:  [branch1 | branch3 | branch5 | branch_max | zero pad]
    W3f = jnp.transpose(w3, (2, 1, 0)).reshape(3 * C3r, C3)   # tap-major
    W5f = jnp.transpose(w5, (2, 1, 0)).reshape(5 * C5r, C5)
    Wmf = w1x1(wm)
    Kb = C1 + 3 * C3r + 5 * C5r + Cin
    Wb = jnp.zeros((Kb, Cpad), f32)
    Wb = Wb.at[0:C1, 0:C1].set(jnp.eye(C1, dtype=f32))
    r0 = C1
    Wb = Wb.at[r0:r0 + 3 * C3r, C1:C1 + C3].set(W3f)
    r0 += 3 * C3r
    Wb = Wb.at[r0:r0 + 5 * C5r, C1 + C3:C1 + C3 + C5].set(W5f)
    r0 += 5 * C5r
    Wb = Wb.at[r0:r0 + Cin, C1 + C3 + C5:Ctot].set(Wmf)
    bb = jnp.zeros((1, Cpad), f32).at[0, C1:Ctot].set(
        jnp.concatenate([b3, b5, bm]))

    # Channel-last, (batch*length)-flattened rows.
    x_rows = jnp.transpose(x_ncl, (0, 2, 1)).reshape(N * L, Cin)

    kernel = functools.partial(_inception_kernel, L=L, C1=C1, C3r=C3r, C5r=C5r)
    full = lambda a: pl.BlockSpec(a.shape, lambda i: (0,) * a.ndim)

    out_rows = pl.pallas_call(
        kernel,
        out_shape=jax.ShapeDtypeStruct((N * L, Cpad), f32),
        grid=(N // NB,),
        in_specs=[
            pl.BlockSpec((R, Cin), lambda i: (i, 0)),
            full(Wa), full(ba), full(Wb), full(bb),
        ],
        out_specs=pl.BlockSpec((R, Cpad), lambda i: (i, 0)),
        compiler_params=pltpu.CompilerParams(
            dimension_semantics=("parallel",)),
    )(x_rows, Wa, ba, Wb, bb)

    out = out_rows[:, :Ctot].reshape(N, L, Ctot)
    return jnp.transpose(out, (0, 2, 1))                      # (N, Ctot, L)


# ----------------------- pure-JAX reference (for checking) -----------------
def _conv1d_ref(x, w, b, padding):
    y = lax.conv_general_dilated(
        x, w, window_strides=(1,), padding=[(padding, padding)],
        dimension_numbers=('NCH', 'OIH', 'NCH'))
    return y + b[None, :, None]


def _maxpool1d_ref(x):
    xp = jnp.pad(x, ((0, 0), (0, 0), (1, 1)), constant_values=-jnp.inf)
    return jnp.maximum(jnp.maximum(xp[:, :, 0:-2], xp[:, :, 1:-1]), xp[:, :, 2:])


def inception_block_ref(x, params):
    (w1, b1, w3r, b3r, w3, b3, w5r, b5r, w5, b5, wm, bm) = params
    relu = lambda a: jnp.maximum(a, 0.0)
    one_d = relu(_conv1d_ref(x, w1, b1, 0))
    three_d = relu(_conv1d_ref(x, w3r, b3r, 0))
    three_d = relu(_conv1d_ref(three_d, w3, b3, 1))
    five_d = relu(_conv1d_ref(x, w5r, b5r, 0))
    five_d = relu(_conv1d_ref(five_d, w5, b5, 2))
    max_d = relu(_maxpool1d_ref(x))
    max_d = relu(_conv1d_ref(max_d, wm, bm, 0))
    return jnp.concatenate([one_d, three_d, five_d, max_d], axis=1)


if __name__ == "__main__":
    # InceptionBlock(in_channels=4, out_channels_1=8, out_channels_3=8,
    #                out_channels_5=8, out_channels_max=8,
    #                three_dim_red=4, five_dim_red=4)
    N, Cin, L = 2, 4, 16
    C1, C3, C5, Cm = 8, 8, 8, 8
    C3r, C5r = 4, 4

    key = jax.random.PRNGKey(0)
    ks = jax.random.split(key, 13)

    def wgen(k, shape):
        return 0.1 * jax.random.normal(k, shape, dtype=jnp.float32)

    params = (
        wgen(ks[0], (C1, Cin, 1)), wgen(ks[1], (C1,)),        # conv1
        wgen(ks[2], (C3r, Cin, 1)), wgen(ks[3], (C3r,)),      # dimred3
        wgen(ks[4], (C3, C3r, 3)), wgen(ks[5], (C3,)),        # conv3
        wgen(ks[6], (C5r, Cin, 1)), wgen(ks[7], (C5r,)),      # dimred5
        wgen(ks[8], (C5, C5r, 5)), wgen(ks[9], (C5,)),        # conv5
        wgen(ks[10], (Cm, Cin, 1)), wgen(ks[11], (Cm,)),      # dimredmax
    )

    x = jax.random.normal(ks[12], (N, Cin, L), dtype=jnp.float32)

    out = jax.block_until_ready(inception_block_pallas(x, params))
    ref = jax.block_until_ready(inception_block_ref(x, params))

    assert out.shape == (N, C1 + C3 + C5 + Cm, L), out.shape
    err = float(jnp.max(jnp.abs(out - ref)))
    assert jnp.allclose(out, ref, atol=1e-4, rtol=1e-4), err

    print("KERNEL_OK")
</pallas_src>

<mosaic_0001>
module attributes {stable_mosaic.version = 11 : i64} {
  func.func @_inception_kernel(%arg0: i32, %arg1: memref<32x4xf32, #tpu.memory_space<vmem>>, %arg2: memref<4x16xf32, #tpu.memory_space<vmem>>, %arg3: memref<1x16xf32, #tpu.memory_space<vmem>>, %arg4: memref<44x128xf32, #tpu.memory_space<vmem>>, %arg5: memref<1x128xf32, #tpu.memory_space<vmem>>, %arg6: memref<32x128xf32, #tpu.memory_space<vmem>>) attributes {dimension_semantics = [#tpu.dimension_semantics<parallel>], iteration_bounds = array<i64: 1>, scalar_prefetch = 0 : i64, scratch_operands = 0 : i64, tpu.core_type = #tpu.core_type<tc>, window_params = [{transform_indices = @transform_0, window_bounds = array<i64: 32, 4>}, {pipeline_mode = #tpu.pipeline_mode<synchronous>, transform_indices = @transform_1, window_bounds = array<i64: 4, 16>}, {pipeline_mode = #tpu.pipeline_mode<synchronous>, transform_indices = @transform_2, window_bounds = array<i64: 1, 16>}, {pipeline_mode = #tpu.pipeline_mode<synchronous>, transform_indices = @transform_3, window_bounds = array<i64: 44, 128>}, {pipeline_mode = #tpu.pipeline_mode<synchronous>, transform_indices = @transform_4, window_bounds = array<i64: 1, 128>}, {transform_indices = @transform_5, window_bounds = array<i64: 32, 128>}]} {
    %c0 = arith.constant 0 : index
    %c0_0 = arith.constant 0 : index
    %0 = vector.load %arg1[%c0, %c0_0] : memref<32x4xf32, #tpu.memory_space<vmem>>, vector<32x4xf32>
    %c0_1 = arith.constant 0 : index
    %c0_2 = arith.constant 0 : index
    %1 = vector.load %arg2[%c0_1, %c0_2] : memref<4x16xf32, #tpu.memory_space<vmem>>, vector<4x16xf32>
    %cst = arith.constant dense<0.000000e+00> : vector<32x16xf32>
    %2 = tpu.matmul %0, %1, %cst {dimension_numbers = #tpu.dot_dimension_numbers<[1], [0], [0], [1], [0, 0, 1, 1], [], []>} : vector<32x4xf32>, vector<4x16xf32>, vector<32x16xf32> -> vector<32x16xf32>
    %c0_3 = arith.constant 0 : index
    %c0_4 = arith.constant 0 : index
    %3 = vector.load %arg3[%c0_3, %c0_4] : memref<1x16xf32, #tpu.memory_space<vmem>>, vector<1x16xf32>
    %4 = vector.broadcast %3 : vector<1x16xf32> to vector<32x16xf32>
    %5 = arith.addf %2, %4 : vector<32x16xf32>
    %cst_5 = arith.constant 0.000000e+00 : f32
    %6 = vector.broadcast %cst_5 : f32 to vector<32x16xf32>
    %7 = arith.maximumf %5, %6 : vector<32x16xf32>
    %8 = vector.extract_strided_slice %7 {offsets = [0, 0], sizes = [32, 8], strides = [1, 1]} : vector<32x16xf32> to vector<32x8xf32>
    %9 = vector.extract_strided_slice %7 {offsets = [0, 8], sizes = [32, 4], strides = [1, 1]} : vector<32x16xf32> to vector<32x4xf32>
    %10 = vector.extract_strided_slice %7 {offsets = [0, 12], sizes = [32, 4], strides = [1, 1]} : vector<32x16xf32> to vector<32x4xf32>
    %11 = tpu.iota {dimensions = array<i32: 0>} : vector<32x1xi32>
    %c16_i32 = arith.constant 16 : i32
    %c0_i32 = arith.constant 0 : i32
    %12 = arith.cmpi eq, %c16_i32, %c0_i32 : i32
    %c1_i32 = arith.constant 1 : i32
    %13 = arith.select %12, %c1_i32, %c16_i32 : i32
    %14 = vector.broadcast %13 : i32 to vector<32x1xi32>
    %15 = arith.remsi %11, %14 : vector<32x1xi32>
    %c0_i32_6 = arith.constant 0 : i32
    %16 = vector.broadcast %c0_i32_6 : i32 to vector<32x1xi32>
    %17 = arith.cmpi ne, %15, %16 : vector<32x1xi32>
    %c0_i32_7 = arith.constant 0 : i32
    %18 = vector.broadcast %c0_i32_7 : i32 to vector<32x1xi32>
    %19 = arith.cmpi slt, %15, %18 : vector<32x1xi32>
    %c0_i32_8 = arith.constant 0 : i32
    %20 = arith.cmpi slt, %13, %c0_i32_8 : i32
    %21 = vector.broadcast %20 : i1 to vector<32x1xi1>
    %22 = vector.broadcast %21 : vector<32x1xi1> to vector<32x1xi1>
    %23 = arith.xori %19, %22 : vector<32x1xi1>
    %24 = arith.andi %23, %17 : vector<32x1xi1>
    %25 = vector.broadcast %13 : i32 to vector<32x1xi32>
    %26 = arith.addi %15, %25 : vector<32x1xi32>
    %27 = arith.select %24, %26, %15 : vector<32x1xi1>, vector<32x1xi32>
    %c1_i32_9 = arith.constant 1 : i32
    %28 = tpu.dynamic_rotate %9 by %c1_i32_9 dim 0 : vector<32x4xf32>, i32 -> vector<32x4xf32>
    %c-1_i32 = arith.constant -1 : i32
    %29 = vector.broadcast %c-1_i32 : i32 to vector<32x1xi32>
    %30 = arith.addi %27, %29 : vector<32x1xi32>
    %c0_i32_10 = arith.constant 0 : i32
    %31 = vector.broadcast %c0_i32_10 : i32 to vector<32x1xi32>
    %32 = arith.cmpi sge, %30, %31 : vector<32x1xi32>
    %c16_i32_11 = arith.constant 16 : i32
    %33 = vector.broadcast %c16_i32_11 : i32 to vector<32x1xi32>
    %34 = arith.cmpi slt, %30, %33 : vector<32x1xi32>
    %35 = arith.andi %32, %34 : vector<32x1xi1>
    %cst_12 = arith.constant 0.000000e+00 : f32
    %36 = vector.shape_cast %35 : vector<32x1xi1> to vector<32x1xi1>
    %37 = vector.broadcast %36 : vector<32x1xi1> to vector<32x4xi1>
    %38 = vector.broadcast %cst_12 : f32 to vector<32x4xf32>
    %39 = arith.select %37, %28, %38 : vector<32x4xi1>, vector<32x4xf32>
    %c31_i32 = arith.constant 31 : i32
    %40 = tpu.dynamic_rotate %9 by %c31_i32 dim 0 : vector<32x4xf32>, i32 -> vector<32x4xf32>
    %c1_i32_13 = arith.constant 1 : i32
    %41 = vector.broadcast %c1_i32_13 : i32 to vector<32x1xi32>
    %42 = arith.addi %27, %41 : vector<32x1xi32>
    %c0_i32_14 = arith.constant 0 : i32
    %43 = vector.broadcast %c0_i32_14 : i32 to vector<32x1xi32>
    %44 = arith.cmpi sge, %42, %43 : vector<32x1xi32>
    %c16_i32_15 = arith.constant 16 : i32
    %45 = vector.broadcast %c16_i32_15 : i32 to vector<32x1xi32>
    %46 = arith.cmpi slt, %42, %45 : vector<32x1xi32>
    %47 = arith.andi %44, %46 : vector<32x1xi1>
    %cst_16 = arith.constant 0.000000e+00 : f32
    %48 = vector.shape_cast %47 : vector<32x1xi1> to vector<32x1xi1>
    %49 = vector.broadcast %48 : vector<32x1xi1> to vector<32x4xi1>
    %50 = vector.broadcast %cst_16 : f32 to vector<32x4xf32>
    %51 = arith.select %49, %40, %50 : vector<32x4xi1>, vector<32x4xf32>
    %c2_i32 = arith.constant 2 : i32
    %52 = tpu.dynamic_rotate %10 by %c2_i32 dim 0 : vector<32x4xf32>, i32 -> vector<32x4xf32>
    %c-2_i32 = arith.constant -2 : i32
    %53 = vector.broadcast %c-2_i32 : i32 to vector<32x1xi32>
    %54 = arith.addi %27, %53 : vector<32x1xi32>
    %c0_i32_17 = arith.constant 0 : i32
    %55 = vector.broadcast %c0_i32_17 : i32 to vector<32x1xi32>
    %56 = arith.cmpi sge, %54, %55 : vector<32x1xi32>
    %c16_i32_18 = arith.constant 16 : i32
    %57 = vector.broadcast %c16_i32_18 : i32 to vector<32x1xi32>
    %58 = arith.cmpi slt, %54, %57 : vector<32x1xi32>
    %59 = arith.andi %56, %58 : vector<32x1xi1>
    %cst_19 = arith.constant 0.000000e+00 : f32
    %60 = vector.shape_cast %59 : vector<32x1xi1> to vector<32x1xi1>
    %61 = vector.broadcast %60 : vector<32x1xi1> to vector<32x4xi1>
    %62 = vector.broadcast %cst_19 : f32 to vector<32x4xf32>
    %63 = arith.select %61, %52, %62 : vector<32x4xi1>, vector<32x4xf32>
    %c1_i32_20 = arith.constant 1 : i32
    %64 = tpu.dynamic_rotate %10 by %c1_i32_20 dim 0 : vector<32x4xf32>, i32 -> vector<32x4xf32>
    %c-1_i32_21 = arith.constant -1 : i32
    %65 = vector.broadcast %c-1_i32_21 : i32 to vector<32x1xi32>
    %66 = arith.addi %27, %65 : vector<32x1xi32>
    %c0_i32_22 = arith.constant 0 : i32
    %67 = vector.broadcast %c0_i32_22 : i32 to vector<32x1xi32>
    %68 = arith.cmpi sge, %66, %67 : vector<32x1xi32>
    %c16_i32_23 = arith.constant 16 : i32
    %69 = vector.broadcast %c16_i32_23 : i32 to vector<32x1xi32>
    %70 = arith.cmpi slt, %66, %69 : vector<32x1xi32>
    %71 = arith.andi %68, %70 : vector<32x1xi1>
    %cst_24 = arith.constant 0.000000e+00 : f32
    %72 = vector.shape_cast %71 : vector<32x1xi1> to vector<32x1xi1>
    %73 = vector.broadcast %72 : vector<32x1xi1> to vector<32x4xi1>
    %74 = vector.broadcast %cst_24 : f32 to vector<32x4xf32>
    %75 = arith.select %73, %64, %74 : vector<32x4xi1>, vector<32x4xf32>
    %c31_i32_25 = arith.constant 31 : i32
    %76 = tpu.dynamic_rotate %10 by %c31_i32_25 dim 0 : vector<32x4xf32>, i32 -> vector<32x4xf32>
    %c1_i32_26 = arith.constant 1 : i32
    %77 = vector.broadcast %c1_i32_26 : i32 to vector<32x1xi32>
    %78 = arith.addi %27, %77 : vector<32x1xi32>
    %c0_i32_27 = arith.constant 0 : i32
    %79 = vector.broadcast %c0_i32_27 : i32 to vector<32x1xi32>
    %80 = arith.cmpi sge, %78, %79 : vector<32x1xi32>
    %c16_i32_28 = arith.constant 16 : i32
    %81 = vector.broadcast %c16_i32_28 : i32 to vector<32x1xi32>
    %82 = arith.cmpi slt, %78, %81 : vector<32x1xi32>
    %83 = arith.andi %80, %82 : vector<32x1xi1>
    %cst_29 = arith.constant 0.000000e+00 : f32
    %84 = vector.shape_cast %83 : vector<32x1xi1> to vector<32x1xi1>
    %85 = vector.broadcast %84 : vector<32x1xi1> to vector<32x4xi1>
    %86 = vector.broadcast %cst_29 : f32 to vector<32x4xf32>
    %87 = arith.select %85, %76, %86 : vector<32x4xi1>, vector<32x4xf32>
    %c30_i32 = arith.constant 30 : i32
    %88 = tpu.dynamic_rotate %10 by %c30_i32 dim 0 : vector<32x4xf32>, i32 -> vector<32x4xf32>
    %c2_i32_30 = arith.constant 2 : i32
    %89 = vector.broadcast %c2_i32_30 : i32 to vector<32x1xi32>
    %90 = arith.addi %27, %89 : vector<32x1xi32>
    %c0_i32_31 = arith.constant 0 : i32
    %91 = vector.broadcast %c0_i32_31 : i32 to vector<32x1xi32>
    %92 = arith.cmpi sge, %90, %91 : vector<32x1xi32>
    %c16_i32_32 = arith.constant 16 : i32
    %93 = vector.broadcast %c16_i32_32 : i32 to vector<32x1xi32>
    %94 = arith.cmpi slt, %90, %93 : vector<32x1xi32>
    %95 = arith.andi %92, %94 : vector<32x1xi1>
    %cst_33 = arith.constant 0.000000e+00 : f32
    %96 = vector.shape_cast %95 : vector<32x1xi1> to vector<32x1xi1>
    %97 = vector.broadcast %96 : vector<32x1xi1> to vector<32x4xi1>
    %98 = vector.broadcast %cst_33 : f32 to vector<32x4xf32>
    %99 = arith.select %97, %88, %98 : vector<32x4xi1>, vector<32x4xf32>
    %c1_i32_34 = arith.constant 1 : i32
    %100 = tpu.dynamic_rotate %0 by %c1_i32_34 dim 0 : vector<32x4xf32>, i32 -> vector<32x4xf32>
    %c-1_i32_35 = arith.constant -1 : i32
    %101 = vector.broadcast %c-1_i32_35 : i32 to vector<32x1xi32>
    %102 = arith.addi %27, %101 : vector<32x1xi32>
    %c0_i32_36 = arith.constant 0 : i32
    %103 = vector.broadcast %c0_i32_36 : i32 to vector<32x1xi32>
    %104 = arith.cmpi sge, %102, %103 : vector<32x1xi32>
    %c16_i32_37 = arith.constant 16 : i32
    %105 = vector.broadcast %c16_i32_37 : i32 to vector<32x1xi32>
    %106 = arith.cmpi slt, %102, %105 : vector<32x1xi32>
    %107 = arith.andi %104, %106 : vector<32x1xi1>
    %cst_38 = arith.constant 0xFF800000 : f32
    %108 = vector.shape_cast %107 : vector<32x1xi1> to vector<32x1xi1>
    %109 = vector.broadcast %108 : vector<32x1xi1> to vector<32x4xi1>
    %110 = vector.broadcast %cst_38 : f32 to vector<32x4xf32>
    %111 = arith.select %109, %100, %110 : vector<32x4xi1>, vector<32x4xf32>
    %112 = arith.maximumf %0, %111 : vector<32x4xf32>
    %c31_i32_39 = arith.constant 31 : i32
    %113 = tpu.dynamic_rotate %0 by %c31_i32_39 dim 0 : vector<32x4xf32>, i32 -> vector<32x4xf32>
    %c1_i32_40 = arith.constant 1 : i32
    %114 = vector.broadcast %c1_i32_40 : i32 to vector<32x1xi32>
    %115 = arith.addi %27, %114 : vector<32x1xi32>
    %c0_i32_41 = arith.constant 0 : i32
    %116 = vector.broadcast %c0_i32_41 : i32 to vector<32x1xi32>
    %117 = arith.cmpi sge, %115, %116 : vector<32x1xi32>
    %c16_i32_42 = arith.constant 16 : i32
    %118 = vector.broadcast %c16_i32_42 : i32 to vector<32x1xi32>
    %119 = arith.cmpi slt, %115, %118 : vector<32x1xi32>
    %120 = arith.andi %117, %119 : vector<32x1xi1>
    %cst_43 = arith.constant 0xFF800000 : f32
    %121 = vector.shape_cast %120 : vector<32x1xi1> to vector<32x1xi1>
    %122 = vector.broadcast %121 : vector<32x1xi1> to vector<32x4xi1>
    %123 = vector.broadcast %cst_43 : f32 to vector<32x4xf32>
    %124 = arith.select %122, %113, %123 : vector<32x4xi1>, vector<32x4xf32>
    %125 = arith.maximumf %112, %124 : vector<32x4xf32>
    %cst_44 = arith.constant 0.000000e+00 : f32
    %126 = vector.broadcast %cst_44 : f32 to vector<32x4xf32>
    %127 = arith.maximumf %125, %126 : vector<32x4xf32>
    %128 = tpu.concatenate %8, %39, %9, %51, %63, %75, %10, %87, %99, %127 in 1 : vector<32x8xf32>, vector<32x4xf32>, vector<32x4xf32>, vector<32x4xf32>, vector<32x4xf32>, vector<32x4xf32>, vector<32x4xf32>, vector<32x4xf32>, vector<32x4xf32>, vector<32x4xf32> -> vector<32x44xf32>
    %c0_45 = arith.constant 0 : index
    %c0_46 = arith.constant 0 : index
    %129 = vector.load %arg4[%c0_45, %c0_46] : memref<44x128xf32, #tpu.memory_space<vmem>>, vector<44x128xf32>
    %cst_47 = arith.constant dense<0.000000e+00> : vector<32x128xf32>
    %130 = tpu.matmul %128, %129, %cst_47 {dimension_numbers = #tpu.dot_dimension_numbers<[1], [0], [0], [1], [0, 0, 1, 1], [], []>} : vector<32x44xf32>, vector<44x128xf32>, vector<32x128xf32> -> vector<32x128xf32>
    %c0_48 = arith.constant 0 : index
    %c0_49 = arith.constant 0 : index
    %131 = vector.load %arg5[%c0_48, %c0_49] : memref<1x128xf32, #tpu.memory_space<vmem>>, vector<1x128xf32>
    %132 = vector.broadcast %131 : vector<1x128xf32> to vector<32x128xf32>
    %133 = arith.addf %130, %132 : vector<32x128xf32>
    %cst_50 = arith.constant 0.000000e+00 : f32
    %134 = vector.broadcast %cst_50 : f32 to vector<32x128xf32>
    %135 = arith.maximumf %133, %134 : vector<32x128xf32>
    %c0_51 = arith.constant 0 : index
    %c0_52 = arith.constant 0 : index
    %136 = vector.load %arg6[%c0_51, %c0_52] : memref<32x128xf32, #tpu.memory_space<vmem>>, vector<32x128xf32>
    tpu.vector_store %arg6[%c0_51, %c0_52], %135 {strides = array<i32>} : memref<32x128xf32, #tpu.memory_space<vmem>>, vector<32x128xf32>,
    return
  }
  func.func @transform_0(%arg0: i32) -> (i32, i32) {
    %c0_i32 = arith.constant 0 : i32
    %c0_i32_0 = arith.constant 0 : i32
    return %arg0, %c0_i32 : i32, i32
  }
  func.func @transform_1(%arg0: i32) -> (i32, i32) {
    %c0_i32 = arith.constant 0 : i32
    %c0_i32_0 = arith.constant 0 : i32
    %c0_i32_1 = arith.constant 0 : i32
    return %c0_i32, %c0_i32_0 : i32, i32
  }
  func.func @transform_2(%arg0: i32) -> (i32, i32) {
    %c0_i32 = arith.constant 0 : i32
    %c0_i32_0 = arith.constant 0 : i32
    %c0_i32_1 = arith.constant 0 : i32
    return %c0_i32, %c0_i32_0 : i32, i32
  }
  func.func @transform_3(%arg0: i32) -> (i32, i32) {
    %c0_i32 = arith.constant 0 : i32
    %c0_i32_0 = arith.constant 0 : i32
    %c0_i32_1 = arith.constant 0 : i32
    return %c0_i32, %c0_i32_0 : i32, i32
  }
  func.func @transform_4(%arg0: i32) -> (i32, i32) {
    %c0_i32 = arith.constant 0 : i32
    %c0_i32_0 = arith.constant 0 : i32
    %c0_i32_1 = arith.constant 0 : i32
    return %c0_i32, %c0_i32_0 : i32, i32
  }
  func.func @transform_5(%arg0: i32) -> (i32, i32) {
    %c0_i32 = arith.constant 0 : i32
    %c0_i32_0 = arith.constant 0 : i32
    return %arg0, %c0_i32 : i32, i32
  }
}

</mosaic_0001>

<bundles_post_ra>
// kernel: tpu_custom_call.1
= control target key start
LH: loop header
LB: loop body
LE: loop exit
PB: predicated region body
PF: predicated region fallthrough
CT: control target
= control target key end

     0   :  { %10 = vsyncpa [#allocation3], 0  ;;  %s1347_s0 = inlined_call_operand.vmem [shape: f32[32,4], index: 0, kind: input, shape index: {}]   ;;  %s1348_s1 = inlined_call_operand.vmem [shape: f32[4,16], index: 1, kind: input, shape index: {}]   ;;  %s1349_s2 = inlined_call_operand.vmem [shape: f32[1,16], index: 2, kind: input, shape index: {}]   ;;  %s1350_s3 = inlined_call_operand.hbm [shape: f32[44,128], index: 3, kind: input, shape index: {}]   ;;  %s1351_s4 = inlined_call_operand.vmem [shape: f32[1,128], index: 4, kind: input, shape index: {}]   ;;  %s1352_s5 = inlined_call_operand.hbm [shape: f32[32,128], index: 5, kind: output, shape index: {}]  }
   0x1   :  { %11 = vsyncpa [#allocation4], 0  ;;  %s897_s18 = smov [#allocation2]   ;;  %s849_s22 = scalar_lea.hbm %s1350_s3, 768 }
   0x2   :  { %s23_s19 = sshll.u32 %s897_s18, 4  ;;  %p850_p0 = scmp.ne.s32.totalorder %s1350_s3, %s849_s22  ;;  %s24_s19 = int_to_ptr.vmem [resolvable:$true] %s23_s19 }
   0x3   :  { %p853_p1 = scmp.lt.u32.totalorder %s849_s22, %s1350_s3 }
   0x5   :  { %p855_p2 = pnand %p853_p1, %p850_p0 }
   0x7   :  { %858 = shalt.err (!%p855_p2)
}
   0x8   :  { %s859_s27 = scalar_lea.vmem %s24_s19, 768  ;;  %p864_p4 = scmp.lt.s32.totalorder %s24_s19, %s24_s19 }
   0x9   :  { %p860_p3 = scmp.ne.s32.totalorder %s24_s19, %s859_s27  ;;  %p865_p5 = scmp.lt.s32.totalorder %s859_s27, %s859_s27 }
   0xb   :  { %p866_p6 = por %p865_p5, %p864_p4 }
   0xd   :  { %p867_p7 = pnand %p866_p6, %p860_p3 }
   0xf   :  { %870 = shalt.err (!%p867_p7)
}
  0x10   :  { %s898_s28 = smov 128   ;;  %s899_s29 = smov 8  }
  0x11   :  { %29 = dma.hbm_to_vmem [thread:$0]  %s1350_s3, 768, %s24_s19, [#allocation3], %s898_s28, %s898_s28, %s899_s29  }
  0x12   :  { %893 = dma.done.wait [#allocation3], 768  }
  0x13   :  { %894 = vsyncadd [#allocation3], 4294966528  ;;  %vm60_vm0 = vcmask 1043456   ;;  %vm47_vm1 = vcmask 31744   ;;  %v39_v0 = vld [vmem:[%s1348_s1] sm:$0xf]  ;;  %v153_v11 = vlaneseq }
  0x14   :  { %v962_v1 = vld [vmem:[%s1347_s0] sm:$0xff]  ;;  %v967_v2 = vld [vmem:[%s1347_s0 + $0x8] sm:$0xff]  ;;  %789 = vmatprep.subr.msk.mxu0 %vm60_vm0, %v39_v0  ;;  %v974_v3 = vld [vmem:[%s1347_s0 + $0x10] sm:$0xff]  ;;  %s900_s17 = smov 116   ;;  %s903_s18 = smov 16   ;;  %vm909_vm10 = vmmov 1  }
  0x15   :  { %791 = vmatprep.mubr.msk.f32.mxu0 %vm47_vm1, %v962_v1  ;;  %790 = vmatpush3.msk.msra.mxu0 %vm60_vm0, %v39_v0  ;;  %v982_v4 = vld [vmem:[%s1347_s0 + $0x18] sm:$0xff]  ;;  %v762_v5 = vld [vmem:[%s1349_s2] ss:$0 sm:$0xff]  ;;  %s901_s0 = smov 120   ;;  %v996_v17 = vshrl.u32 %v153_v11, 7  ;;  %v406_v20 = vrot.slane %v962_v1, 7  ;;  %vm824_vm11 = vmpackc.low %vm60_vm0, %vm909_vm10 }
  0x16   :  { %792 = vmatmul.mubr.msk.f32.vlgmr.msra.gmra.mrb[0].mxu0 %vm47_vm1, %v967_v2  ;;  %v409_v21 = vrot.slane %v982_v4, 7  ;;  %s902_s2 = smov 4   ;;  %v422_v25 = vrot.slane %v962_v1, 1  ;;  %v423_v26 = vrot.slane %v967_v2, 1  ;;  %s904_s19 = smov 40   ;;  %v407_v34 = vrot.slane %v967_v2, 7 }
  0x17   :  { %794 = vmatprep.mubr.msk.f32.mxu0 %vm47_vm1, %v974_v3  ;;  %v162_v19 = vand.u32 15, %v996_v17  ;;  %vm226_vm2 = vcmp.lt.s32.totalorder %v996_v17, 1  ;;  %vm263_vm4 = vcmp.lt.s32.totalorder %v996_v17, 7  ;;  %v1034_v31 = vadd.s32 8, %v996_v17  ;;  %s905_s20 = smov 20   ;;  %s906_s21 = smov 24  }
  0x18   :  { %v413_v24 = vsel %vm226_vm2, %v409_v21, %v406_v20  ;;  %v428_v29 = vsel %vm263_vm4, %v422_v25, %v423_v26  ;;  %v424_v35 = vrot.slane %v974_v3, 1  ;;  %v1049_v37 = vadd.s32 24, %v996_v17  ;;  %s907_s22 = smov 32   ;;  %s908_s23 = smov 36  }
  0x19   :  { %v1007_v23 = vadd.s32 4294967295, %v162_v19  ;;  %v169_v33 = vand.u32 15, %v1034_v31  ;;  %v412_v38 = vsel %vm226_vm2, %v406_v20, %v407_v34  ;;  %v425_v45 = vrot.slane %v982_v4, 1  ;;  %s910_s26 = smov [#allocation5]  }
  0x1a   :  { %795 = vmatmul.mubr.msk.f32.gmra.mrb[2].mxu0 %vm47_vm1, %v982_v4  ;;  %v427_v39 = vsel %vm263_vm4, %v423_v26, %v424_v35  ;;  %v419_v40 = vmax.f32 %v967_v2, %v412_v38  ;;  %v183_v43 = vand.u32 15, %v1049_v37  ;;  %v317_v56 = vadd.s32 4294967294, %v162_v19  ;;  %s750_s27 = sshll.u32 %s910_s26, 4  ;;  %s751_s27 = int_to_ptr.vmem [resolvable:$true] %s750_s27 }
  0x1b   :  { %vm235_vm3 = vcmp.ge.s32.totalorder %v1007_v23, 0  ;;  %v1046_v36 = vadd.s32 1, %v169_v33  ;;  %v429_v46 = vsel %vm263_vm4, %v425_v45, %v422_v25  ;;  %vm312_vm7 = vcmp.lt.s32.totalorder %v996_v17, 2  ;;  %p876_p9 = scmp.lt.s32.totalorder %s751_s27, %s751_s27 }
  0x1c   :  { %v414_v27 = vsel %vm235_vm3, %v413_v24, -inf  ;;  %v1068_v44 = vadd.s32 1, %v183_v43  ;;  %vm321_vm8 = vcmp.ge.s32.totalorder %v317_v56, 0  ;;  %vm373_vm9 = vcmp.lt.s32.totalorder %v996_v17, 6 }
  0x1d   :  { %v418_v28 = vmax.f32 %v962_v1, %v414_v27  ;;  %vm277_vm5 = vcmp.lt.s32.totalorder %v1046_v36, 16  ;;  %v381_v23 = vadd.s32 2, %v183_v43  ;;  %vm578_vm0 = vcmask 64512  }
  0x1e   :  { %v431_v41 = vsel %vm277_vm5, %v427_v39, -inf  ;;  %vm279_vm6 = vcmp.lt.s32.totalorder %v1068_v44, 16  ;;  %v628_v44 = vld [vmem:[#allocation2 + $0x28] sm:$0xf]  ;;  %vm583_vm1 = vcmask 97280  }
  0x1f   :  { %v434_v30 = vmax.f32 %v418_v28, %v428_v29  ;;  %v1063_v42 = vmax.f32 %v419_v40, %v431_v41  ;;  %v1078_v47 = vsel %vm279_vm6, %v429_v46, -inf  ;;  %vm389_vm12 = vcmp.lt.s32.totalorder %v381_v23, 16 }
  0x21   :  { %v438_v32 = vmax.f32 %v434_v30, 0.0 }
  0xe9   :  { %v793_v6 = vpop.f32.mrb[0].mxu0 }
  0xea   :  { %v136_v7 = vadd.f32 %v793_v6, %v762_v5  ;;  %v130_v8 = vpop.f32.mrb[1].mxu0 }
  0xeb   :  { %v131_v10 = vadd.f32 %v762_v5, %v130_v8 }
  0xec   :  { %v988_v9 = vmax.f32 %v136_v7, 0.0 }
  0xed   :  { %v796_v12 = vpop.f32.mrb[2].mxu0  ;;  %v992_v15 = vmax.f32 %v131_v10, 0.0 }
  0xee   :  { %v146_v13 = vadd.f32 %v796_v12, %v762_v5  ;;  %298 = vrot.lane.b32.xlu1 %v988_v9, %s900_s17  ;;  %212 = vrot.lane.b32.xlu0 %v988_v9, %s901_s0  ;;  %v140_v14 = vpop.f32.mrb[3].mxu0 }
  0xef   :  { %v141_v18 = vadd.f32 %v762_v5, %v140_v14 }
  0xf0   :  { %v994_v16 = vmax.f32 %v146_v13, 0.0 }
  0xf1   :  { %v1005_v22 = vmax.f32 %v141_v18, 0.0 }
  0xf2   :  { %216 = vrot.lane.b32.xlu1 %v994_v16, %s901_s0  ;;  %210 = vrot.lane.b32.xlu0 %v992_v15, %s901_s0 }
  0xf6   :  { %302 = vrot.lane.b32.xlu1 %v994_v16, %s900_s17  ;;  %296 = vrot.lane.b32.xlu0 %v992_v15, %s900_s17 }
  0xfa   :  { %214 = vrot.lane.b32.xlu1 %v1005_v22, %s901_s0  ;;  %458 = vrot.lane.b32.xlu0 %v992_v15, %s902_s2 }
  0xfe   :  { %464 = vrot.lane.b32.xlu1 %v994_v16, %s902_s2  ;;  %300 = vrot.lane.b32.xlu0 %v1005_v22, %s900_s17 }
 0x102   :  { %524 = vrot.lane.b32.xlu1 %v994_v16, %s903_s18  ;;  %460 = vrot.lane.b32.xlu0 %v988_v9, %s902_s2 }
 0x106   :  { %462 = vrot.lane.b32.xlu1 %v1005_v22, %s902_s2  ;;  %518 = vrot.lane.b32.xlu0 %v992_v15, %s903_s18 }
 0x10a   :  { %522 = vrot.lane.b32.xlu1 %v1005_v22, %s903_s18  ;;  %520 = vrot.lane.b32.xlu0 %v988_v9, %s903_s18 }
 0x10e   :  { %566 = vrot.lane.b32.xlu0 %v438_v32, %s904_s19 }
 0x160   :  { %v1080_v48 = vpop.permute.xlu1 %298  ;;  %v1082_v49 = vpop.permute.xlu0 %212 }
 0x161   :  { %v223_v52 = vrot.slane %v1082_v49, 7  ;;  %v260_v59 = vrot.slane %v1082_v49, 1  ;;  %v309_v0 = vrot.slane %v1080_v48, 6  ;;  %v346_v18 = vrot.slane %v1080_v48, 7 }
 0x162   :  { %v358_v27 = vrot.slane %v1080_v48, 1  ;;  %v370_v38 = vrot.slane %v1080_v48, 2 }
 0x164   :  { %v217_v50 = vpop.permute.xlu1 %216  ;;  %v211_v51 = vpop.permute.xlu0 %210 }
 0x165   :  { %v222_v53 = vrot.slane %v211_v51, 7  ;;  %v259_v54 = vrot.slane %v211_v51, 1  ;;  %v225_v1 = vrot.slane %v217_v50, 7  ;;  %v262_v14 = vrot.slane %v217_v50, 1 }
 0x167   :  { %v229_v55 = vsel %vm226_vm2, %v222_v53, %v223_v52  ;;  %v266_v62 = vsel %vm263_vm4, %v259_v54, %v260_v59  ;;  %v267_v26 = vsel %vm263_vm4, %v262_v14, %v259_v54  ;;  %v230_v46 = vsel %vm226_vm2, %v225_v1, %v222_v53  ;;  %v624_v53 = vld [vmem:[#allocation2 + $0x8] sm:$0xff] }
 0x168   :  { %v1089_v57 = vpop.permute.xlu1 %302  ;;  %448 = vrot.lane.b32.xlu0 %v229_v55, %s899_s29  ;;  %v1092_v58 = vpop.permute.xlu0 %296  ;;  %v295_v30 = vsel %vm279_vm6, %v267_v26, 0.0  ;;  %v255_v54 = vsel %vm235_vm3, %v230_v46, 0.0 }
 0x169   :  { %v311_v60 = vrot.slane %v1089_v57, 6  ;;  %v308_v61 = vrot.slane %v1092_v58, 6  ;;  %v345_v10 = vrot.slane %v1092_v58, 7  ;;  %v357_v19 = vrot.slane %v1092_v58, 1 }
 0x16a   :  { %v369_v28 = vrot.slane %v1092_v58, 2  ;;  %v348_v50 = vrot.slane %v1089_v57, 7  ;;  %v360_v56 = vrot.slane %v1089_v57, 1 }
 0x16b   :  { %v316_v6 = vsel %vm312_vm7, %v311_v60, %v308_v61  ;;  %v315_v13 = vsel %vm312_vm7, %v308_v61, %v309_v0  ;;  %v351_v24 = vsel %vm226_vm2, %v345_v10, %v346_v18  ;;  %v363_v32 = vsel %vm263_vm4, %v357_v19, %v358_v27 }
 0x16c   :  { %v1102_v63 = vpop.permute.xlu1 %214  ;;  %474 = vrot.lane.b32.xlu0 %v266_v62, %s903_s18  ;;  %v1109_v7 = vpop.permute.xlu0 %458  ;;  %v341_v8 = vsel %vm321_vm8, %v316_v6, 0.0  ;;  %v376_v40 = vsel %vm373_vm9, %v369_v28, %v370_v38  ;;  %v625_v6 = vld [vmem:[#allocation2 + $0x10] sm:$0xff]  ;;  %vm618_vm8 = vcmask 326656  }
 0x16d   :  { %v224_v5 = vrot.slane %v1102_v63, 7  ;;  %v261_v11 = vrot.slane %v1102_v63, 1 }
 0x16f   :  { %v227_v12 = vsel %vm226_vm2, %v224_v5, %v225_v1  ;;  %v264_v20 = vsel %vm263_vm4, %v261_v11, %v262_v14  ;;  %v156_v1 = vadd.s32 16, %v996_v17  ;;  %v364_v14 = vsel %vm263_vm4, %v360_v56, %v357_v19  ;;  %v627_v19 = vld [vmem:[#allocation2 + $0x20] sm:$0xff] }
 0x170   :  { %452 = vrot.lane.b32.xlu1 %v227_v12, %s899_s29  ;;  %492 = vrot.lane.b32.xlu0 %v315_v13, %s905_s20  ;;  %v1133_v25 = vpop.permute.xlu0 %300  ;;  %v626_v12 = vld [vmem:[#allocation2 + $0x18] sm:$0xff]  ;;  %v352_v13 = vsel %vm226_vm2, %v348_v50, %v345_v10  ;;  %v265_v10 = vsel %vm263_vm4, %v260_v59, %v261_v11  ;;  %v379_v11 = vadd.s32 2, %v169_v33  ;;  %v228_v2 = vsel %vm226_vm2, %v223_v52, %v224_v5 }
 0x171   :  { %v310_v29 = vrot.slane %v1133_v25, 6  ;;  %v347_v39 = vrot.slane %v1133_v25, 7  ;;  %v359_v51 = vrot.slane %v1133_v25, 1  ;;  %v353_v26 = vsel %vm235_vm3, %v352_v13, 0.0 }
 0x172   :  { %vm387_vm14 = vcmp.lt.s32.totalorder %v379_v11, 16  ;;  %v426_v52 = vsel %vm263_vm4, %v424_v35, %v425_v45  ;;  %vm593_vm3 = vcmask 162816  }
 0x173   :  { %v313_v41 = vsel %vm312_vm7, %v310_v29, %v311_v60  ;;  %v349_v55 = vsel %vm226_vm2, %v347_v39, %v348_v50  ;;  %v623_v60 = vld [vmem:[#allocation2] sm:$0xff]  ;;  %v361_v62 = vsel %vm263_vm4, %v359_v51, %v360_v56  ;;  %v362_v37 = vsel %vm263_vm4, %v358_v27, %v359_v51  ;;  %v1275_v51 = vpop.permute.xlu1 %464 }
 0x174   :  { %478 = vrot.lane.b32.xlu1 %v264_v20, %s903_s18  ;;  %508 = vrot.lane.b32.xlu0 %v351_v24, %s906_s21  ;;  %v815_v61 = vpack.c.bf16 %v624_v53, %v623_v60  ;;  %v819_v20 = vpack.c.bf16 %v626_v12, %v625_v6  ;;  %v371_v24 = vrot.slane %v1133_v25, 2  ;;  %v314_v49 = vsel %vm312_vm7, %v309_v0, %v310_v29  ;;  %v461_v25 = vpop.permute.xlu0 %460 }
 0x175   :  { %vm598_vm4 = vcmask 195584   ;;  %vm608_vm7 = vcmask 261120  }
 0x176   :  { %816 = vmatprep.subr.bf16.mxu0 %v815_v61  ;;  %829 = vmatprep.subr.bf16.mxu1 %v815_v61  ;;  %v375_v31 = vsel %vm373_vm9, %v370_v38, %v371_v24  ;;  %v439_v38 = vmax.f32 %v1063_v42, 0.0 }
 0x177   :  { %818 = vmatpush3.bf16.msra.mxu0 %v815_v61  ;;  %832 = vmatpush3.bf16.msra.mxu1 %v815_v61  ;;  %v403_v36 = vsel %vm387_vm14, %v375_v31, 0.0 }
 0x178   :  { %480 = vrot.lane.b32.xlu1 %v295_v30, %s903_s18  ;;  %534 = vrot.lane.b32.xlu0 %v363_v32, %s907_s22  ;;  %v176_v30 = vand.u32 15, %v156_v1  ;;  %v372_v32 = vrot.slane %v1089_v57, 2  ;;  %v408_v57 = vrot.slane %v974_v3, 7  ;;  %v519_v48 = vpop.permute.xlu0 %518 }
 0x179   :  { %820 = vmatprep.subr.bf16.mxu0 %v819_v20  ;;  %830 = vmatprep.subr.bf16.mxu1 %v819_v20 }
 0x17a   :  { %v374_v46 = vsel %vm373_vm9, %v371_v24, %v372_v32  ;;  %v233_v59 = vadd.s32 4294967295, %v176_v30  ;;  %v377_v43 = vsel %vm373_vm9, %v372_v32, %v369_v28  ;;  %v411_v50 = vsel %vm226_vm2, %v407_v34, %v408_v57 }
 0x17b   :  { %822 = vmatpush3.bf16.msra.mxu0 %v819_v20  ;;  %833 = vmatpush3.bf16.msra.mxu1 %v819_v20  ;;  %v405_v27 = vsel %vm389_vm12, %v377_v43, 0.0  ;;  %v319_v33 = vadd.s32 4294967294, %v176_v30  ;;  %v410_v42 = vsel %vm226_vm2, %v408_v57, %v409_v21  ;;  %vm636_vm9 = vcmask 359424  }
 0x17c   :  { %550 = vrot.lane.b32.xlu0 %v376_v40, %s908_s23  ;;  %496 = vrot.lane.b32.xlu1 %v313_v41, %s905_s20  ;;  %v823_v40 = vpack.c.bf16 %v628_v44, %v627_v19  ;;  %v293_v41 = vsel %vm277_vm5, %v265_v10, 0.0  ;;  %vm237_vm13 = vcmp.ge.s32.totalorder %v233_v59, 0  ;;  %v421_v35 = vmax.f32 %v982_v4, %v410_v42  ;;  %v521_v17 = vpop.permute.xlu0 %520 }
 0x17d   :  { %v416_v34 = vsel %vm237_vm13, %v411_v50, -inf  ;;  %v257_v58 = vsel %vm237_vm13, %v228_v2, 0.0  ;;  %vm323_vm15 = vcmp.ge.s32.totalorder %v319_v33, 0 }
 0x17e   :  { %825 = vmatprep.subr.msk.bf16.mxu0 %vm824_vm11, %v823_v40  ;;  %831 = vmatprep.subr.msk.bf16.mxu1 %vm824_vm11, %v823_v40  ;;  %v420_v28 = vmax.f32 %v974_v3, %v416_v34  ;;  %v343_v63 = vsel %vm323_vm15, %v314_v49, 0.0  ;;  %v350_v3 = vsel %vm226_vm2, %v346_v18, %v347_v39  ;;  %v437_v5 = vmax.f32 %v421_v35, %v1078_v47  ;;  %v1277_v18 = vpop.permute.xlu1 %524 }
 0x17f   :  { %828 = vmatpush3.bf16.msk.msra.mxu0 %vm824_vm11, %v823_v40  ;;  %834 = vmatpush3.bf16.msk.msra.mxu1 %vm824_vm11, %v823_v40  ;;  %v355_v45 = vsel %vm237_vm13, %v350_v3, 0.0  ;;  %vm588_vm2 = vcmask 130048  }
 0x180   :  { %446 = vrot.lane.b32.xlu0 %v255_v54, %s899_s29  ;;  %512 = vrot.lane.b32.xlu1 %v349_v55, %s906_s21  ;;  %v366_v54 = vsel %vm277_vm5, %v362_v37, 0.0  ;;  %v436_v0 = vmax.f32 %v420_v28, %v426_v52  ;;  %v441_v29 = vmax.f32 %v437_v5, 0.0  ;;  %v567_v4 = vpop.permute.xlu0 %566  ;;  %vm603_vm5 = vcmask 228352  }
 0x182   :  { %v440_v21 = vmax.f32 %v436_v0, 0.0  ;;  %v463_v39 = vpop.permute.xlu1 %462 }
 0x184   :  { %490 = vrot.lane.b32.xlu0 %v341_v8, %s905_s20  ;;  %538 = vrot.lane.b32.xlu1 %v361_v62, %s907_s22  ;;  %v368_v8 = vsel %vm279_vm6, %v364_v14, 0.0  ;;  %vm613_vm6 = vcmask 293888  }
 0x186   :  { %v1279_v56 = vpop.permute.xlu1 %522 }
 0x188   :  { %506 = vrot.lane.b32.xlu0 %v353_v26, %s906_s21  ;;  %540 = vrot.lane.b32.xlu1 %v368_v8, %s907_s22 }
 0x18c   :  { %476 = vrot.lane.b32.xlu0 %v293_v41, %s903_s18  ;;  %554 = vrot.lane.b32.xlu1 %v374_v46, %s908_s23 }
 0x190   :  { %536 = vrot.lane.b32.xlu0 %v366_v54, %s907_s22  ;;  %556 = vrot.lane.b32.xlu1 %v405_v27, %s908_s23 }
 0x194   :  { %552 = vrot.lane.b32.xlu0 %v403_v36, %s908_s23  ;;  %450 = vrot.lane.b32.xlu1 %v257_v58, %s899_s29 }
 0x198   :  { %568 = vrot.lane.b32.xlu0 %v439_v38, %s904_s19  ;;  %494 = vrot.lane.b32.xlu1 %v343_v63, %s905_s20 }
 0x19c   :  { %510 = vrot.lane.b32.xlu1 %v355_v45, %s906_s21 }
 0x1a0   :  { %570 = vrot.lane.b32.xlu1 %v440_v21, %s904_s19 }
 0x1a4   :  { %572 = vrot.lane.b32.xlu1 %v441_v29, %s904_s19 }
 0x1da   :  { %v449_v55 = vpop.permute.xlu0 %448 }
 0x1db   :  { %v580_v44 = vsel %vm578_vm0, %v988_v9, %v449_v55 }
 0x1dc   :  { %v585_v41 = vsel %vm583_vm1, %v580_v44, %v461_v25 }
 0x1de   :  { %v475_v60 = vpop.permute.xlu0 %474 }
 0x1e2   :  { %v453_v53 = vpop.permute.xlu1 %452  ;;  %v493_v47 = vpop.permute.xlu0 %492 }
 0x1e3   :  { %v582_v49 = vsel %vm578_vm0, %v994_v16, %v453_v53 }
 0x1e6   :  { %v479_v61 = vpop.permute.xlu1 %478  ;;  %v509_v62 = vpop.permute.xlu0 %508 }
 0x1ea   :  { %v481_v1 = vpop.permute.xlu1 %480  ;;  %v535_v6 = vpop.permute.xlu0 %534 }
 0x1ee   :  { %v497_v12 = vpop.permute.xlu1 %496  ;;  %v551_v13 = vpop.permute.xlu0 %550 }
 0x1f2   :  { %v513_v14 = vpop.permute.xlu1 %512  ;;  %v447_v20 = vpop.permute.xlu0 %446 }
 0x1f3   :  { %v579_v24 = vsel %vm578_vm0, %v992_v15, %v447_v20 }
 0x1f4   :  { %v584_v26 = vsel %vm583_vm1, %v579_v24, %v1109_v7 }
 0x1f5   :  { %v589_v32 = vsel %vm588_vm2, %v584_v26, %v475_v60 }
 0x1f6   :  { %v539_v8 = vpop.permute.xlu1 %538  ;;  %v491_v30 = vpop.permute.xlu0 %490 }
 0x1f7   :  { %v594_v10 = vsel %vm593_vm3, %v589_v32, %v491_v30 }
 0x1fa   :  { %v541_v23 = vpop.permute.xlu1 %540  ;;  %v507_v19 = vpop.permute.xlu0 %506 }
 0x1fb   :  { %v599_v15 = vsel %vm598_vm4, %v594_v10, %v507_v19 }
 0x1fc   :  { %v604_v7 = vsel %vm603_vm5, %v599_v15, %v519_v48 }
 0x1fd   :  { %v609_v40 = vsel %vm608_vm7, %v604_v7, %v535_v6 }
 0x1fe   :  { %v555_v57 = vpop.permute.xlu1 %554  ;;  %v477_v46 = vpop.permute.xlu0 %476  ;;  %v614_v59 = vsel %vm613_vm6, %v609_v40, %v551_v13 }
 0x1ff   :  { %v590_v37 = vsel %vm588_vm2, %v585_v41, %v477_v46  ;;  %v619_v9 = vsel %vm618_vm8, %v614_v59, %v567_v4 }
 0x200   :  { %v595_v43 = vsel %vm593_vm3, %v590_v37, %v493_v47  ;;  %809 = vmatprep.mubr.msk.f32.mxu0 %vm636_vm9, %v619_v9 }
 0x201   :  { %v600_v54 = vsel %vm598_vm4, %v595_v43, %v509_v62 }
 0x202   :  { %v557_v11 = vpop.permute.xlu1 %556  ;;  %v537_v50 = vpop.permute.xlu0 %536  ;;  %v605_v27 = vsel %vm603_vm5, %v600_v54, %v521_v17 }
 0x203   :  { %v610_v36 = vsel %vm608_vm7, %v605_v27, %v537_v50 }
 0x206   :  { %v451_v31 = vpop.permute.xlu1 %450  ;;  %v553_v2 = vpop.permute.xlu0 %552 }
 0x207   :  { %v581_v33 = vsel %vm578_vm0, %v1005_v22, %v451_v31  ;;  %v615_v58 = vsel %vm613_vm6, %v610_v36, %v553_v2  ;;  %v587_v22 = vsel %vm583_vm1, %v582_v49, %v1275_v51 }
 0x208   :  { %v586_v34 = vsel %vm583_vm1, %v581_v33, %v463_v39  ;;  %v592_v0 = vsel %vm588_vm2, %v587_v22, %v481_v1 }
 0x209   :  { %v591_v52 = vsel %vm588_vm2, %v586_v34, %v479_v61  ;;  %v597_v45 = vsel %vm593_vm3, %v592_v0, %v497_v12 }
 0x20a   :  { %v495_v28 = vpop.permute.xlu1 %494  ;;  %v569_v38 = vpop.permute.xlu0 %568  ;;  %v602_v21 = vsel %vm598_vm4, %v597_v45, %v513_v14 }
 0x20b   :  { %v620_v42 = vsel %vm618_vm8, %v615_v58, %v569_v38  ;;  %v596_v63 = vsel %vm593_vm3, %v591_v52, %v495_v28  ;;  %v607_v51 = vsel %vm603_vm5, %v602_v21, %v1277_v18 }
 0x20c   :  { %810 = vmatmul.mubr.msk.f32.vlgmr.msra.gmra.mrb[4].mxu0 %vm636_vm9, %v620_v42  ;;  %v612_v17 = vsel %vm608_vm7, %v607_v51, %v541_v23 }
 0x20d   :  { %v617_v4 = vsel %vm613_vm6, %v612_v17, %v557_v11 }
 0x20e   :  { %v511_v3 = vpop.permute.xlu1 %510 }
 0x20f   :  { %v601_v35 = vsel %vm598_vm4, %v596_v63, %v511_v3 }
 0x210   :  { %v606_v16 = vsel %vm603_vm5, %v601_v35, %v1279_v56  ;;  %v768_v56 = vld [vmem:[%s1351_s4] ss:$0 sm:$0xff]  ;;  %s871_s4 = scalar_lea.vmem %s751_s27, 512 }
 0x211   :  { %v611_v5 = vsel %vm608_vm7, %v606_v16, %v539_v8  ;;  %p872_p8 = scmp.ne.s32.totalorder %s751_s27, %s871_s4  ;;  %p877_p10 = scmp.lt.s32.totalorder %s871_s4, %s871_s4 }
 0x212   :  { %v571_v29 = vpop.permute.xlu1 %570  ;;  %v616_v25 = vsel %vm613_vm6, %v611_v5, %v555_v57 }
 0x213   :  { %v621_v48 = vsel %vm618_vm8, %v616_v25, %v571_v29  ;;  %p878_p11 = por %p877_p10, %p876_p9 }
 0x214   :  { %812 = vmatprep.mubr.msk.f32.mxu1 %vm636_vm9, %v621_v48 }
 0x215   :  { %p879_p12 = pnand %p878_p11, %p872_p8 }
 0x216   :  { %v573_v39 = vpop.permute.xlu1 %572 }
 0x217   :  { %v622_v55 = vsel %vm618_vm8, %v617_v4, %v573_v39 }
 0x218   :  { %813 = vmatmul.mubr.msk.f32.vlgmr.msra.gmra.mrb[0].mxu1 %vm636_vm9, %v622_v55 }
 0x2df   :  { %v811_v60 = vpop.f32.mrb[4].mxu0 }
 0x2e0   :  { %v724_v53 = vadd.f32 %v811_v60, %v768_v56  ;;  %v718_v47 = vpop.f32.mrb[5].mxu0 }
 0x2e1   :  { %v719_v61 = vadd.f32 %v768_v56, %v718_v47 }
 0x2e2   :  { %v738_v18 = vmax.f32 %v724_v53, 0.0 }
 0x2e3   :  { %v737_v62 = vmax.f32 %v719_v61, 0.0 }
 0x2e4   :  { %742 = vst [vmem:[#allocation5 + $0x8] sm:$0xff] %v738_v18 }
 0x2e5   :  { %741 = vst [vmem:[#allocation5] sm:$0xff] %v737_v62 }
 0x2eb   :  { %v814_v1 = vpop.f32.mrb[0].mxu1 }
 0x2ec   :  { %v734_v6 = vadd.f32 %v814_v1, %v768_v56  ;;  %v728_v12 = vpop.f32.mrb[1].mxu1 }
 0x2ed   :  { %v729_v13 = vadd.f32 %v768_v56, %v728_v12 }
 0x2ee   :  { %v740_v14 = vmax.f32 %v734_v6, 0.0 }
 0x2ef   :  { %v739_v20 = vmax.f32 %v729_v13, 0.0 }
 0x2f0   :  { %744 = vst [vmem:[#allocation5 + $0x18] sm:$0xff] %v740_v14 }
 0x2f1   :  { %743 = vst [vmem:[#allocation5 + $0x10] sm:$0xff] %v739_v20 }
 0x2f2   :  { %882 = shalt.err (!%p879_p12)
}
 0x2f3   :  { %s883_s7 = scalar_lea.hbm %s1352_s5, 512 }
 0x2f4   :  { %p884_p13 = scmp.ne.s32.totalorder %s1352_s5, %s883_s7  ;;  %p887_p0 = scmp.lt.u32.totalorder %s883_s7, %s1352_s5 }
 0x2f6   :  { %p889_p1 = pnand %p887_p0, %p884_p13 }
 0x2f8   :  { %892 = shalt.err (!%p889_p1)
}
 0x2f9   :  { %756 = dma.vmem_to_hbm [thread:$0]  %s751_s27, 512, %s1352_s5, [#allocation4], %s898_s28, %s898_s28, %s899_s29  }
 0x2fa   :  { %895 = dma.done.wait [#allocation4], 512  }
 0x2fb   :  { %896 = vsyncadd [#allocation4], 4294966784 }
 0x2fc   :  { %760 = vsyncpa [#allocation3], 1 }
 0x2fd   :  { %761 = vsyncpa [#allocation4], 1 }

</bundles_post_ra>
